<compile_context>
chip_gen: v5e
topology: v5e:2x2
jax: 0.10.0
libtpu: 0.0.40
codegen_flags: <defaults>
</compile_context>

<pallas_src>
import math

import jax
import jax.numpy as jnp
from jax.experimental import pallas as pl
from jax.experimental.pallas import tpu as pltpu


def _gather_kernel(idx_ref, pcT_ref, outT_ref, acc_ref):
    """One-hot MXU gather of n_keep points for one batch, tiled over points.

    idx_ref  : VMEM (1, 1, n_keep) int32  -- keep indices for batch b
    pcT_ref  : VMEM (1, C, tile_n)        -- point-cloud tile (lane-dense N)
    outT_ref : VMEM (1, C, n_keep)        -- gathered output (transposed)
    acc_ref  : VMEM (C, n_keep) f32       -- accumulator across point tiles
    """
    t = pl.program_id(1)
    tile_n = pcT_ref.shape[2]
    n_keep = outT_ref.shape[2]

    @pl.when(t == 0)
    def _():
        acc_ref[...] = jnp.zeros_like(acc_ref)

    idx = idx_ref[0]                                   # (1, n_keep) int32
    base = t * tile_n
    # onehot^T[n, k] = (base + n == idx[k]) over this point tile.
    local = jax.lax.broadcasted_iota(jnp.int32, (tile_n, n_keep), 0) + base
    onehot_t = (local == idx).astype(pcT_ref.dtype)    # (tile_n, n_keep)

    # (C, tile_n) @ (tile_n, n_keep) -> (C, n_keep); exact row selection.
    acc_ref[...] += jnp.dot(pcT_ref[0], onehot_t,
                            preferred_element_type=jnp.float32)

    @pl.when(t == pl.num_programs(1) - 1)
    def _():
        outT_ref[0] = acc_ref[...].astype(outT_ref.dtype)


def point_cloud_dropout(pc, keep_idx, *, tile_n=None):
    """pc: (bs, n_points, C) float; keep_idx: (bs, n_keep) int32 -> (bs, n_keep, C)."""
    bs, n_points, c = pc.shape
    n_keep = keep_idx.shape[-1]

    if tile_n is None:
        # Keep blocks a few KiB..MiB; tile the point axis when it is large.
        tile_n = 2048 if (n_points > 2048 and n_points % 2048 == 0) else n_points
    assert n_points % tile_n == 0, "tile_n must divide n_points"
    n_tiles = n_points // tile_n

    # Layout plumbing (outside the kernel): put the point axis on lanes.
    pcT = jnp.transpose(pc, (0, 2, 1))                       # (bs, C, N)
    idx3 = keep_idx.astype(jnp.int32).reshape(bs, 1, n_keep)  # (bs, 1, n_keep)

    itemsize = jnp.dtype(pc.dtype).itemsize
    cost = pl.CostEstimate(
        flops=2 * bs * c * n_points * n_keep,
        transcendentals=0,
        bytes_accessed=(bs * n_points * c * itemsize       # read pc
                        + bs * n_keep * c * itemsize        # write out
                        + bs * n_keep * 4),                 # read idx
    )

    outT = pl.pallas_call(
        _gather_kernel,
        out_shape=jax.ShapeDtypeStruct((bs, c, n_keep), pc.dtype),
        grid_spec=pltpu.PrefetchScalarGridSpec(
            num_scalar_prefetch=0,
            grid=(bs, n_tiles),
            in_specs=[
                pl.BlockSpec((1, 1, n_keep), lambda b, t: (b, 0, 0)),   # indices
                pl.BlockSpec((1, c, tile_n), lambda b, t: (b, 0, t)),   # pc^T tile
            ],
            out_specs=pl.BlockSpec((1, c, n_keep), lambda b, t: (b, 0, 0)),
            scratch_shapes=[pltpu.VMEM((c, n_keep), jnp.float32)],
        ),
        compiler_params=pltpu.CompilerParams(
            dimension_semantics=("parallel", "arbitrary"),  # batch // TCs, point-axis reduction
        ),
        cost_estimate=cost,
    )(idx3, pcT)

    return jnp.transpose(outT, (0, 2, 1))                   # (bs, n_keep, C)


def make_keep_indices(key, bs, n_points, keep_prob):
    """Equivalent of torch.cat([torch.randperm(n_points)[:n_keep] for _ in range(bs)])."""
    n_keep = math.ceil(n_points * keep_prob)
    keys = jax.random.split(key, bs)
    perms = jax.vmap(lambda k: jax.random.permutation(k, n_points)[:n_keep])(keys)
    return perms.astype(jnp.int32)


if __name__ == "__main__":
    keep_prob = 0.07                        # module default
    bs, n_points, c = 2, 128, 3             # small point cloud: 2 batches, 128 xyz points
    n_keep = math.ceil(n_points * keep_prob)

    key = jax.random.PRNGKey(0)
    k_pc, k_idx = jax.random.split(key)
    pc = jax.random.normal(k_pc, (bs, n_points, c), dtype=jnp.float32)
    keep_idx = make_keep_indices(k_idx, bs, n_points, keep_prob)

    out = point_cloud_dropout(pc, keep_idx)
    out = jax.block_until_ready(out)

    # Reference: plain-JAX gather identical to pc[batch_idxs, point_idxs].view(bs, n_keep, -1)
    ref = jnp.stack([pc[b][keep_idx[b]] for b in range(bs)])
    assert out.shape == (bs, n_keep, c), out.shape
    assert jnp.allclose(out, ref), "mismatch vs reference gather"

    print("KERNEL_OK")
</pallas_src>

<mosaic_0001>
module attributes {stable_mosaic.version = 11 : i64} {
  func.func @_gather_kernel(%arg0: i32, %arg1: i32, %arg2: memref<1x1x9xi32, #tpu.memory_space<vmem>>, %arg3: memref<1x3x128xf32, #tpu.memory_space<vmem>>, %arg4: memref<1x3x9xf32, #tpu.memory_space<vmem>>, %arg5: memref<3x9xf32, #tpu.memory_space<vmem>>) attributes {dimension_semantics = [#tpu.dimension_semantics<parallel>, #tpu.dimension_semantics<arbitrary>], iteration_bounds = array<i64: 2, 1>, scalar_prefetch = 0 : i64, scratch_operands = 1 : i64, tpu.core_type = #tpu.core_type<tc>, window_params = [{transform_indices = @transform_0, window_bounds = array<i64: 1, 1, 9>}, {transform_indices = @transform_1, window_bounds = array<i64: 1, 3, 128>}, {transform_indices = @transform_2, window_bounds = array<i64: 1, 3, 9>}]} {
    %c0_i32 = arith.constant 0 : i32
    %0 = arith.cmpi eq, %arg1, %c0_i32 : i32
    %1 = arith.extui %0 : i1 to i32
    %c0_i32_0 = arith.constant 0 : i32
    %2 = arith.cmpi ne, %1, %c0_i32_0 : i32
    scf.if %2 {
      %cst_12 = arith.constant 0.000000e+00 : f32
      %22 = vector.broadcast %cst_12 : f32 to vector<3x9xf32>
      %c0_13 = arith.constant 0 : index
      %c0_14 = arith.constant 0 : index
      %23 = vector.load %arg5[%c0_13, %c0_14] : memref<3x9xf32, #tpu.memory_space<vmem>>, vector<3x9xf32>
      tpu.vector_store %arg5[%c0_13, %c0_14], %22 {strides = array<i32>} : memref<3x9xf32, #tpu.memory_space<vmem>>, vector<3x9xf32>,
    } else {
    }
    %c0 = arith.constant 0 : index
    %c0_1 = arith.constant 0 : index
    %c0_2 = arith.constant 0 : index
    %3 = vector.load %arg2[%c0, %c0_1, %c0_2] : memref<1x1x9xi32, #tpu.memory_space<vmem>>, vector<1x1x9xi32>
    %4 = vector.shape_cast %3 : vector<1x1x9xi32> to vector<1x9xi32>
    %c128_i32 = arith.constant 128 : i32
    %5 = arith.muli %arg1, %c128_i32 : i32
    %6 = tpu.iota {dimensions = array<i32: 0>} : vector<128x9xi32>
    %7 = vector.broadcast %5 : i32 to vector<128x9xi32>
    %8 = arith.addi %6, %7 : vector<128x9xi32>
    %9 = vector.broadcast %4 : vector<1x9xi32> to vector<128x9xi32>
    %10 = arith.cmpi eq, %8, %9 : vector<128x9xi32>
    %11 = arith.extui %10 : vector<128x9xi1> to vector<128x9xi32>
    %12 = arith.sitofp %11 : vector<128x9xi32> to vector<128x9xf32>
    %c0_3 = arith.constant 0 : index
    %c0_4 = arith.constant 0 : index
    %13 = vector.load %arg5[%c0_3, %c0_4] : memref<3x9xf32, #tpu.memory_space<vmem>>, vector<3x9xf32>
    %c0_5 = arith.constant 0 : index
    %c0_6 = arith.constant 0 : index
    %c0_7 = arith.constant 0 : index
    %14 = vector.load %arg3[%c0_5, %c0_6, %c0_7] : memref<1x3x128xf32, #tpu.memory_space<vmem>>, vector<1x3x128xf32>
    %15 = vector.shape_cast %14 : vector<1x3x128xf32> to vector<3x128xf32>
    %cst = arith.constant dense<0.000000e+00> : vector<3x9xf32>
    %16 = tpu.matmul %15, %12, %cst {dimension_numbers = #tpu.dot_dimension_numbers<[1], [0], [0], [1], [0, 0, 1, 1], [], []>} : vector<3x128xf32>, vector<128x9xf32>, vector<3x9xf32> -> vector<3x9xf32>
    %17 = arith.addf %13, %16 : vector<3x9xf32>
    %c0_8 = arith.constant 0 : index
    %c0_9 = arith.constant 0 : index
    %18 = vector.load %arg5[%c0_8, %c0_9] : memref<3x9xf32, #tpu.memory_space<vmem>>, vector<3x9xf32>
    tpu.vector_store %arg5[%c0_8, %c0_9], %17 {strides = array<i32>} : memref<3x9xf32, #tpu.memory_space<vmem>>, vector<3x9xf32>,
    %c0_i32_10 = arith.constant 0 : i32
    %19 = arith.cmpi eq, %arg1, %c0_i32_10 : i32
    %20 = arith.extui %19 : i1 to i32
    %c0_i32_11 = arith.constant 0 : i32
    %21 = arith.cmpi ne, %20, %c0_i32_11 : i32
    scf.if %21 {
      %c0_12 = arith.constant 0 : index
      %c0_13 = arith.constant 0 : index
      %22 = vector.load %arg5[%c0_12, %c0_13] : memref<3x9xf32, #tpu.memory_space<vmem>>, vector<3x9xf32>
      %c0_14 = arith.constant 0 : index
      %c0_15 = arith.constant 0 : index
      %c0_16 = arith.constant 0 : index
      %23 = vector.load %arg4[%c0_14, %c0_15, %c0_16] : memref<1x3x9xf32, #tpu.memory_space<vmem>>, vector<1x3x9xf32>
      %24 = vector.shape_cast %23 : vector<1x3x9xf32> to vector<3x9xf32>
      %25 = vector.shape_cast %22 : vector<3x9xf32> to vector<1x3x9xf32>
      tpu.vector_store %arg4[%c0_14, %c0_15, %c0_16], %25 {strides = array<i32>} : memref<1x3x9xf32, #tpu.memory_space<vmem>>, vector<1x3x9xf32>,
    } else {
    }
    return
  }
  func.func @transform_0(%arg0: i32, %arg1: i32) -> (i32, i32, i32) {
    %c0_i32 = arith.constant 0 : i32
    %c0_i32_0 = arith.constant 0 : i32
    %c0_i32_1 = arith.constant 0 : i32
    return %arg0, %c0_i32, %c0_i32_0 : i32, i32, i32
  }
  func.func @transform_1(%arg0: i32, %arg1: i32) -> (i32, i32, i32) {
    %c0_i32 = arith.constant 0 : i32
    %c0_i32_0 = arith.constant 0 : i32
    return %arg0, %c0_i32, %arg1 : i32, i32, i32
  }
  func.func @transform_2(%arg0: i32, %arg1: i32) -> (i32, i32, i32) {
    %c0_i32 = arith.constant 0 : i32
    %c0_i32_0 = arith.constant 0 : i32
    %c0_i32_1 = arith.constant 0 : i32
    return %arg0, %c0_i32, %c0_i32_0 : i32, i32, i32
  }
}

</mosaic_0001>

<bundles_post_ra>
// kernel: tpu_custom_call.1
= control target key start
LH: loop header
LB: loop body
LE: loop exit
PB: predicated region body
PF: predicated region fallthrough
CT: control target
= control target key end

     0   :  { %s479_s9 = smov 0   ;;  %s481_s10 = smov 0   ;;  %s522_s0 = inlined_call_operand.vmem [shape: s32[2,1,9], index: 0, kind: input, shape index: {}]   ;;  %s523_s1 = inlined_call_operand.vmem [shape: f32[2,3,128], index: 1, kind: input, shape index: {}]   ;;  %s524_s2 = inlined_call_operand.vmem [shape: f32[2,3,9], index: 2, kind: output, shape index: {}]  }
   0x1   :  { %s483_s11 = smov 0  }
   0x2 LB: > { %s24_s12 = sadd.s32 1, %s456_s10  ;;  %p374_p0 = scmp.ge.s32.totalorder %s460_s11, 1  ;;  %s460_s11 = sphi %s483_s11, %s12_s11   ;;  %s456_s10 = sphi %s481_s10, %s526_s10   ;;  %s452_s9 = sphi %s479_s9, %s525_s9  }
   0x3   : > { %p26_p1 = scmp.ge.s32.totalorder %s24_s12, 2  ;;  %p136_p2 = scmp.lt.s32.totalorder %s460_s11, 3 }
   0x5   : > { %s528_s12 = smov (%p26_p1, %s24_s12), 0  ;;  %p137_p3 = pnand %p374_p0, %p136_p2 }
   0x6   : > { %p162_p4 = scmp.lt.s32.totalorder (!%p137_p3), %s452_s9, 1 }
   0x7   : > { %140 = sbr.rel (%p137_p3) target bundleno = 187 (0xbb), region = 28 }
   0xc   : > { %v184_v0 = vlaneseq  ;;  %s530_s9 = smov (!%p162_p4, %s452_s9), 1  ;;  %v462_v7 = vmov 1.0   ;;  %vm180_vm4 = vcmask 67584   ;;  %v463_v10 = vmov 0.0  }
   0xd   : > { %s164_s15 = scalar_lea.vmem %s522_s0, %s530_s9  ;;  %181 = vst.msk [vmem:[#allocation2] sm:$0x7] %vm180_vm4, %v463_v10  ;;  %s375_s16 = sshll.u32 %s530_s9, 2 }
   0xe   : > { %v185_v1 = vshrl.u32 %v184_v0, 7  ;;  %v437_v4 = vld [vmem:[%s164_s15] ss:$0 sm:$0xff]  ;;  %s171_s19 = scalar_lea.vmem %s523_s1, %s375_s16  ;;  %s175_s22 = scalar_lea.vmem %s524_s2, %s375_s16 }
   0xf   : > { %v268_v20 = vld [vmem:[%s171_s19] sm:$0x7] }
  0x10   : > { %v200_v2 = vadd.s32 120, %v185_v1  ;;  %v199_v3 = vadd.s32 112, %v185_v1  ;;  %v198_v5 = vadd.s32 104, %v185_v1  ;;  %v197_v6 = vadd.s32 96, %v185_v1 }
  0x11   : > { %v196_v8 = vadd.s32 88, %v185_v1  ;;  %v195_v9 = vadd.s32 80, %v185_v1  ;;  %v194_v11 = vadd.s32 72, %v185_v1  ;;  %v193_v12 = vadd.s32 64, %v185_v1 }
  0x12   : > { %vm234_vm0 = vcmp.eq.s32.totalorder %v200_v2, %v437_v4  ;;  %vm233_vm1 = vcmp.eq.s32.totalorder %v199_v3, %v437_v4  ;;  %vm232_vm2 = vcmp.eq.s32.totalorder %v198_v5, %v437_v4  ;;  %vm231_vm3 = vcmp.eq.s32.totalorder %v197_v6, %v437_v4 }
  0x13   : > { %393 = vmatpush.msk.msra.mxu0 %vm234_vm0, %v462_v7  ;;  %vm230_vm5 = vcmp.eq.s32.totalorder %v196_v8, %v437_v4  ;;  %vm229_vm6 = vcmp.eq.s32.totalorder %v195_v9, %v437_v4  ;;  %vm228_vm7 = vcmp.eq.s32.totalorder %v194_v11, %v437_v4  ;;  %v192_v13 = vadd.s32 56, %v185_v1 }
  0x14   : > { %vm227_vm8 = vcmp.eq.s32.totalorder %v193_v12, %v437_v4  ;;  %v191_v14 = vadd.s32 48, %v185_v1  ;;  %v190_v15 = vadd.s32 40, %v185_v1  ;;  %v189_v16 = vadd.s32 32, %v185_v1  ;;  %v267_v21 = vld [vmem:[#allocation2] sm:$0x7] }
  0x15   : > { %394 = vmatpush.msk.msra.mxu0 %vm233_vm1, %v462_v7  ;;  %vm226_vm9 = vcmp.eq.s32.totalorder %v192_v13, %v437_v4  ;;  %v188_v17 = vadd.s32 24, %v185_v1  ;;  %v187_v18 = vadd.s32 16, %v185_v1  ;;  %v186_v19 = vadd.s32 8, %v185_v1 }
  0x16   : > { %vm225_vm10 = vcmp.eq.s32.totalorder %v191_v14, %v437_v4  ;;  %vm224_vm11 = vcmp.eq.s32.totalorder %v190_v15, %v437_v4  ;;  %vm223_vm12 = vcmp.eq.s32.totalorder %v189_v16, %v437_v4  ;;  %vm219_vm0 = vcmp.eq.s32.totalorder %v185_v1, %v437_v4 }
  0x17   : > { %395 = vmatpush.msk.msra.mxu0 %vm232_vm2, %v462_v7  ;;  %vm222_vm13 = vcmp.eq.s32.totalorder %v188_v17, %v437_v4  ;;  %vm221_vm14 = vcmp.eq.s32.totalorder %v187_v18, %v437_v4  ;;  %vm220_vm15 = vcmp.eq.s32.totalorder %v186_v19, %v437_v4 }
  0x19   : > { %396 = vmatpush.msk.msra.mxu0 %vm231_vm3, %v462_v7 }
  0x1b   : > { %397 = vmatpush.msk.msra.mxu0 %vm230_vm5, %v462_v7 }
  0x1d   : > { %398 = vmatpush.msk.msra.mxu0 %vm229_vm6, %v462_v7 }
  0x1f   : > { %399 = vmatpush.msk.msra.mxu0 %vm228_vm7, %v462_v7 }
  0x21   : > { %400 = vmatpush.msk.msra.mxu0 %vm227_vm8, %v462_v7 }
  0x23   : > { %401 = vmatpush.msk.msra.mxu0 %vm226_vm9, %v462_v7 }
  0x25   : > { %402 = vmatpush.msk.msra.mxu0 %vm225_vm10, %v462_v7 }
  0x27   : > { %403 = vmatpush.msk.msra.mxu0 %vm224_vm11, %v462_v7 }
  0x29   : > { %404 = vmatpush.msk.msra.mxu0 %vm223_vm12, %v462_v7 }
  0x2b   : > { %405 = vmatpush.msk.msra.mxu0 %vm222_vm13, %v462_v7 }
  0x2d   : > { %406 = vmatpush.msk.msra.mxu0 %vm221_vm14, %v462_v7 }
  0x2f   : > { %407 = vmatpush.msk.msra.mxu0 %vm220_vm15, %v462_v7 }
  0x31   : > { %408 = vmatpush.msk.msra.mxu0 %vm219_vm0, %v462_v7 }
  0x32   : > { %285 = vmatmul.f32.vlgmr.msra.gmra.mxu0 %v268_v20 }
  0xaf   : > { %v286_v22 = vpop.f32.mrf.mxu0 }
  0xb0   : > { %v289_v23 = vadd.f32 %v286_v22, %v267_v21 }
  0xb2   : > { %291 = vst.msk [vmem:[#allocation2] sm:$0x7] %vm180_vm4, %v289_v23 }
  0xb9   : > { %v295_v24 = vld [vmem:[#allocation2] sm:$0x7] }
  0xba   : > { %296 = vst.msk [vmem:[%s175_s22] sm:$0x7] %vm180_vm4, %v295_v24 }
  0xbb PF: > { %s12_s11 = sadd.s32 1, %s460_s11   ;;  %s525_s9 = smov %s456_s10 }
  0xbc   : > { %p9_p5 = scmp.ge.s32.totalorder %s12_s11, 4   ;;  %s526_s10 = smov %s528_s12 }
  0xbe   :  { %11 = sbr.rel (!%p9_p5) target bundleno = 2 (0x2), region = 69 }

</bundles_post_ra>
